<compile_context>
chip_gen: v7x
topology: tpu7x:2x2x1
jax: 0.10.0
libtpu: 0.0.40
codegen_flags: <defaults>
</compile_context>

<pallas_src>
import jax
import jax.numpy as jnp
from jax.experimental import pallas as pl
from jax.experimental.pallas import tpu as pltpu

TM = 256            # output-row tile (MXU friendly on all generations)
TK = 512            # reduction (adjacency-column) tile; TK % TM == 0
LANE = 128          # lane width: feature dims are padded to a multiple of this
VMEM_LIMIT = 48 * 1024 * 1024      # fits v7x (64 MiB/TC) and v5e/v6e (128 MiB)
RESIDENT_LIMIT = 24 * 1024 * 1024  # cap for double-buffered resident XW1/HW2


def _round_up(v, m):
    return ((v + m - 1) // m) * m


# ----------------------------- Pallas kernels ---------------------------------

def _xw_kernel(x_ref, w1_ref, o_ref):
    """Prologue: XW1 = X @ W1 (computed once per encoder / row tile)."""
    o_ref[...] = jnp.dot(x_ref[...], w1_ref[...],
                         preferred_element_type=jnp.float32).astype(o_ref.dtype)


def _make_layer1_kernel(resident):
    """HW2 = relu(A @ XW1 + b1) @ W2, tiled over the K (adjacency col) axis."""

    def kernel(a_ref, xw_ref, b1_ref, w2_ref, o_ref, acc_ref):
        k = pl.program_id(2)

        @pl.when(k == 0)
        def _():
            acc_ref[...] = jnp.zeros_like(acc_ref)

        if resident:
            start = pl.multiple_of(k * TK, TK)
            xw = xw_ref[pl.ds(start, TK), :]     # slice of VMEM-resident operand
        else:
            xw = xw_ref[...]
        acc_ref[...] += jnp.dot(a_ref[...], xw, preferred_element_type=jnp.float32)

        @pl.when(k == pl.num_programs(2) - 1)
        def _():
            h = jnp.maximum(acc_ref[...] + b1_ref[...], 0.0).astype(jnp.bfloat16)
            o_ref[...] = jnp.dot(h, w2_ref[...],
                                 preferred_element_type=jnp.float32).astype(o_ref.dtype)

    return kernel


def _make_layer2_kernel(resident):
    """Z = A @ HW2 + b2, tiled over the K axis."""

    def kernel(a_ref, hw_ref, b2_ref, o_ref, acc_ref):
        k = pl.program_id(2)

        @pl.when(k == 0)
        def _():
            acc_ref[...] = jnp.zeros_like(acc_ref)

        if resident:
            start = pl.multiple_of(k * TK, TK)
            hw = hw_ref[pl.ds(start, TK), :]
        else:
            hw = hw_ref[...]
        acc_ref[...] += jnp.dot(a_ref[...], hw, preferred_element_type=jnp.float32)

        @pl.when(k == pl.num_programs(2) - 1)
        def _():
            o_ref[...] = (acc_ref[...] + b2_ref[...]).astype(o_ref.dtype)

    return kernel


# ------------------------------ Pallas wrapper ---------------------------------

def gcn2_batched_pallas(a_stack_p, x, w1_s, b1_s, w2_s, b2_s, n_valid, lat):
    """Batched (over E encoders) 2-layer GCN.

    a_stack_p: [E, n_pad, n_pad] bf16 (normalized adjacency, zero-padded),
    x: [N, F] f32 (shared), w1_s: [E, F, H], b1_s: [E, 1, H],
    w2_s: [E, H, L], b2_s: [E, 1, L].  Returns [E, N, L] f32.
    """
    e, n_pad, _ = a_stack_p.shape
    f_in = x.shape[1]
    hid = w1_s.shape[2]

    f_pad = _round_up(f_in, LANE)
    h_pad = _round_up(hid, LANE)
    l_pad = _round_up(lat, LANE)

    bf16 = jnp.bfloat16
    x_p = jnp.pad(x, ((0, n_pad - x.shape[0]), (0, f_pad - f_in))).astype(bf16)
    w1_p = jnp.pad(w1_s, ((0, 0), (0, f_pad - f_in), (0, h_pad - hid))).astype(bf16)
    b1_p = jnp.pad(b1_s, ((0, 0), (0, 0), (0, h_pad - hid))).astype(jnp.float32)
    w2_p = jnp.pad(w2_s, ((0, 0), (0, h_pad - hid), (0, l_pad - lat))).astype(bf16)
    b2_p = jnp.pad(b2_s, ((0, 0), (0, 0), (0, l_pad - lat))).astype(jnp.float32)

    ni = n_pad // TM
    nk = n_pad // TK

    # TODO(synk): on v7x, put pltpu.CORE_PARALLEL on the row-tile axis to engage
    # both TensorCores; plain "parallel" kept here for cross-generation safety.
    cparams_2d = pltpu.CompilerParams(
        dimension_semantics=("parallel", "parallel"),
        vmem_limit_bytes=VMEM_LIMIT)
    cparams_3d = pltpu.CompilerParams(
        dimension_semantics=("parallel", "parallel", "arbitrary"),
        vmem_limit_bytes=VMEM_LIMIT)

    # ---- prologue: XW1[e] = X @ W1[e] (small, computed once, lane-dense) ----
    xw1 = pl.pallas_call(
        _xw_kernel,
        out_shape=jax.ShapeDtypeStruct((e, n_pad, h_pad), bf16),
        grid=(e, ni),
        in_specs=[
            pl.BlockSpec((TM, f_pad), lambda ei, i: (i, 0)),
            pl.BlockSpec((None, f_pad, h_pad), lambda ei, i: (ei, 0, 0)),
        ],
        out_specs=pl.BlockSpec((None, TM, h_pad), lambda ei, i: (ei, i, 0)),
        compiler_params=cparams_2d,
    )(x_p, w1_p)

    # Keep the [n_pad, 128] XW1 / HW2 operands VMEM-resident (re-DMA'd only when
    # the encoder index changes); fall back to streaming TK-row slices per K step
    # for very large graphs.
    resident = 2 * n_pad * max(h_pad, l_pad) * 2 <= RESIDENT_LIMIT
    if resident:
        xw_spec = pl.BlockSpec((None, n_pad, h_pad), lambda ei, i, k: (ei, 0, 0))
        hw_spec = pl.BlockSpec((None, n_pad, l_pad), lambda ei, i, k: (ei, 0, 0))
    else:
        xw_spec = pl.BlockSpec((None, TK, h_pad), lambda ei, i, k: (ei, k, 0))
        hw_spec = pl.BlockSpec((None, TK, l_pad), lambda ei, i, k: (ei, k, 0))
    a_spec = pl.BlockSpec((None, TM, TK), lambda ei, i, k: (ei, i, k))

    # ---- layer 1 (+ fused W2): HW2[e] = relu(A[e] @ XW1[e] + b1[e]) @ W2[e] ----
    l1_cost = pl.CostEstimate(
        flops=2 * e * (n_pad * n_pad * h_pad + n_pad * h_pad * l_pad),
        transcendentals=0,
        bytes_accessed=int(a_stack_p.size * 2 + e * n_pad * h_pad * 2
                           + w2_p.size * 2 + e * n_pad * l_pad * 2))
    hw2 = pl.pallas_call(
        _make_layer1_kernel(resident),
        out_shape=jax.ShapeDtypeStruct((e, n_pad, l_pad), bf16),
        grid=(e, ni, nk),
        in_specs=[
            a_spec,
            xw_spec,
            pl.BlockSpec((None, 1, h_pad), lambda ei, i, k: (ei, 0, 0)),
            pl.BlockSpec((None, h_pad, l_pad), lambda ei, i, k: (ei, 0, 0)),
        ],
        out_specs=pl.BlockSpec((None, TM, l_pad), lambda ei, i, k: (ei, i, 0)),
        scratch_shapes=[pltpu.VMEM((TM, h_pad), jnp.float32)],
        compiler_params=cparams_3d,
        cost_estimate=l1_cost,
    )(a_stack_p, xw1, b1_p, w2_p)

    # ---- layer 2: Z[e] = A[e] @ HW2[e] + b2[e] (bf16 writeback) ----
    l2_cost = pl.CostEstimate(
        flops=2 * e * n_pad * n_pad * l_pad,
        transcendentals=0,
        bytes_accessed=int(a_stack_p.size * 2 + e * n_pad * l_pad * 2
                           + e * n_pad * l_pad * 2))
    z = pl.pallas_call(
        _make_layer2_kernel(resident),
        out_shape=jax.ShapeDtypeStruct((e, n_pad, l_pad), bf16),
        grid=(e, ni, nk),
        in_specs=[
            a_spec,
            hw_spec,
            pl.BlockSpec((None, 1, l_pad), lambda ei, i, k: (ei, 0, 0)),
        ],
        out_specs=pl.BlockSpec((None, TM, l_pad), lambda ei, i, k: (ei, i, 0)),
        scratch_shapes=[pltpu.VMEM((TM, l_pad), jnp.float32)],
        compiler_params=cparams_3d,
        cost_estimate=l2_cost,
    )(a_stack_p, hw2, b2_p)

    return z[:, :n_valid, :lat].astype(jnp.float32)


# -------------------------------- JAX glue -------------------------------------

def normalized_adjacency(edge_index, num_nodes, n_pad=None, dtype=jnp.float32):
    """Dense Ahat = D^{-1/2}(A + I)D^{-1/2}; built directly zero-padded to n_pad.

    Padded rows/cols have zero degree -> zero rows/cols in Ahat.
    """
    # TODO(synk): duplicate edges are deduplicated by .set(); verify against the
    # reference encoder's gcn_norm behavior if multigraph edges are expected.
    if n_pad is None:
        n_pad = num_nodes
    src, dst = edge_index[0], edge_index[1]
    adj = jnp.zeros((n_pad, n_pad), jnp.float32)
    adj = adj.at[dst, src].set(1.0)                     # aggregate src -> dst
    idx = jnp.arange(num_nodes)
    adj = adj.at[idx, idx].add(1.0)                     # self loops on real nodes
    deg = jnp.sum(adj, axis=1)
    d_inv_sqrt = jnp.where(deg > 0, 1.0 / jnp.sqrt(deg), 0.0)
    return (adj * d_inv_sqrt[:, None] * d_inv_sqrt[None, :]).astype(dtype)


def init_gcn_params(key, in_dim, hidden_dim, out_dim):
    k1, k2 = jax.random.split(key)
    s1 = 1.0 / jnp.sqrt(jnp.float32(in_dim))
    s2 = 1.0 / jnp.sqrt(jnp.float32(hidden_dim))
    w1 = jax.random.uniform(k1, (in_dim, hidden_dim), jnp.float32, -s1, s1)
    b1 = jnp.zeros((1, hidden_dim), jnp.float32)
    w2 = jax.random.uniform(k2, (hidden_dim, out_dim), jnp.float32, -s2, s2)
    b2 = jnp.zeros((1, out_dim), jnp.float32)
    return w1, b1, w2, b2


def lscgnn_forward(params, data):
    """Equivalent of LSCGNN.forward: returns (target_latent, reg_latent)."""
    x = data["x"]
    n = x.shape[0]
    n_pad = _round_up(n, max(TM, TK))
    bf16 = jnp.bfloat16

    # Adjacency is built directly as padded bf16 (no extra pad+cast HBM pass).
    a_reg = normalized_adjacency(data["reg_edge_index"], n, n_pad, bf16)  # reg_net
    a_rec = normalized_adjacency(data["edge_index"], n, n_pad, bf16)      # recon_net

    # Encoder 0 = reg_net, encoder 1 = recon_net -> one fused batched call.
    a_stack = jnp.stack([a_reg, a_rec], axis=0)
    w1_s = jnp.stack([params["reg_net"][0], params["recon_net"][0]])
    b1_s = jnp.stack([params["reg_net"][1], params["recon_net"][1]])
    w2_s = jnp.stack([params["reg_net"][2], params["recon_net"][2]])
    b2_s = jnp.stack([params["reg_net"][3], params["recon_net"][3]])

    lat = w2_s.shape[2]
    z = gcn2_batched_pallas(a_stack, x, w1_s, b1_s, w2_s, b2_s, n, lat)
    reg_latent = z[0]
    target_latent = z[1]
    return target_latent, reg_latent


# Pure-JAX reference mirroring the kernel math (bf16 operands, f32 accumulation,
# bf16 writeback of the final latent).
def _gcn2_ref(a, x, w1, b1, w2, b2):
    bf16 = jnp.bfloat16
    ab = a.astype(bf16)
    xw = jnp.dot(x.astype(bf16), w1.astype(bf16),
                 preferred_element_type=jnp.float32).astype(bf16)
    h = jnp.maximum(jnp.dot(ab, xw, preferred_element_type=jnp.float32) + b1,
                    0.0).astype(bf16)
    hw = jnp.dot(h, w2.astype(bf16),
                 preferred_element_type=jnp.float32).astype(bf16)
    z = jnp.dot(ab, hw, preferred_element_type=jnp.float32) + b2
    return z.astype(bf16).astype(jnp.float32)


if __name__ == "__main__":
    N, F_IN, HIDDEN, LATENT = 16, 8, 32, 16
    E_REG, E_REC = 40, 48

    key = jax.random.PRNGKey(0)
    kx, ke1, ke2, kp1, kp2 = jax.random.split(key, 5)

    x = jax.random.normal(kx, (N, F_IN), jnp.float32)
    reg_edge_index = jax.random.randint(ke1, (2, E_REG), 0, N, jnp.int32)
    edge_index = jax.random.randint(ke2, (2, E_REC), 0, N, jnp.int32)
    data = {"x": x, "reg_edge_index": reg_edge_index, "edge_index": edge_index}

    params = {
        "reg_net": init_gcn_params(kp1, F_IN, HIDDEN, LATENT),
        "recon_net": init_gcn_params(kp2, F_IN, HIDDEN, LATENT),
        # TODO(synk): task_head is declared in LSCGNN.__init__ but unused in forward().
    }

    target_latent, reg_latent = lscgnn_forward(params, data)
    jax.block_until_ready((target_latent, reg_latent))

    # verify against the pure-JAX reference
    a_reg = normalized_adjacency(reg_edge_index, N)
    a_rec = normalized_adjacency(edge_index, N)
    ref_reg = _gcn2_ref(a_reg, x, *params["reg_net"])
    ref_tgt = _gcn2_ref(a_rec, x, *params["recon_net"])
    assert jnp.allclose(reg_latent, ref_reg, atol=2e-2, rtol=2e-2)
    assert jnp.allclose(target_latent, ref_tgt, atol=2e-2, rtol=2e-2)

    print("KERNEL_OK")
</pallas_src>

<mosaic_0001>
module attributes {stable_mosaic.version = 11 : i64} {
  func.func @_xw_kernel(%arg0: i32, %arg1: i32, %arg2: memref<256x128xbf16, #tpu.memory_space<vmem>>, %arg3: memref<1x128x128xbf16, #tpu.memory_space<vmem>>, %arg4: memref<1x256x128xbf16, #tpu.memory_space<vmem>>) attributes {dimension_semantics = [#tpu.dimension_semantics<parallel>, #tpu.dimension_semantics<parallel>], iteration_bounds = array<i64: 2, 2>, scalar_prefetch = 0 : i64, scratch_operands = 0 : i64, tpu.core_type = #tpu.core_type<tc>, window_params = [{transform_indices = @transform_0, window_bounds = array<i64: 256, 128>}, {transform_indices = @transform_1, window_bounds = array<i64: 1, 128, 128>}, {transform_indices = @transform_2, window_bounds = array<i64: 1, 256, 128>}]} {
    %c0 = arith.constant 0 : index
    %c0_0 = arith.constant 0 : index
    %0 = vector.load %arg2[%c0, %c0_0] : memref<256x128xbf16, #tpu.memory_space<vmem>>, vector<256x128xbf16>
    %c0_1 = arith.constant 0 : index
    %c0_2 = arith.constant 0 : index
    %c0_3 = arith.constant 0 : index
    %1 = vector.load %arg3[%c0_1, %c0_2, %c0_3] : memref<1x128x128xbf16, #tpu.memory_space<vmem>>, vector<1x128x128xbf16>
    %2 = vector.shape_cast %1 : vector<1x128x128xbf16> to vector<128x128xbf16>
    %cst = arith.constant dense<0.000000e+00> : vector<256x128xf32>
    %3 = tpu.matmul %0, %2, %cst {dimension_numbers = #tpu.dot_dimension_numbers<[1], [0], [0], [1], [0, 0, 1, 1], [], []>} : vector<256x128xbf16>, vector<128x128xbf16>, vector<256x128xf32> -> vector<256x128xf32>
    %4 = arith.truncf %3 : vector<256x128xf32> to vector<256x128xbf16>
    %c0_4 = arith.constant 0 : index
    %c0_5 = arith.constant 0 : index
    %c0_6 = arith.constant 0 : index
    %5 = vector.load %arg4[%c0_4, %c0_5, %c0_6] : memref<1x256x128xbf16, #tpu.memory_space<vmem>>, vector<1x256x128xbf16>
    %6 = vector.shape_cast %5 : vector<1x256x128xbf16> to vector<256x128xbf16>
    %7 = vector.shape_cast %4 : vector<256x128xbf16> to vector<1x256x128xbf16>
    tpu.vector_store %arg4[%c0_4, %c0_5, %c0_6], %7 {strides = array<i32>} : memref<1x256x128xbf16, #tpu.memory_space<vmem>>, vector<1x256x128xbf16>,
    return
  }
  func.func @transform_0(%arg0: i32, %arg1: i32) -> (i32, i32) {
    %c0_i32 = arith.constant 0 : i32
    %c0_i32_0 = arith.constant 0 : i32
    return %arg1, %c0_i32 : i32, i32
  }
  func.func @transform_1(%arg0: i32, %arg1: i32) -> (i32, i32, i32) {
    %c0_i32 = arith.constant 0 : i32
    %c0_i32_0 = arith.constant 0 : i32
    %c0_i32_1 = arith.constant 0 : i32
    return %arg0, %c0_i32, %c0_i32_0 : i32, i32, i32
  }
  func.func @transform_2(%arg0: i32, %arg1: i32) -> (i32, i32, i32) {
    %c0_i32 = arith.constant 0 : i32
    %c0_i32_0 = arith.constant 0 : i32
    return %arg0, %arg1, %c0_i32 : i32, i32, i32
  }
}

</mosaic_0001>

<bundles_post_ra>
// kernel: tpu_custom_call.1
= control target key start
LH: loop header
LB: loop body
LE: loop exit
PB: predicated region body
PF: predicated region fallthrough
CT: control target
= control target key end

     0   :  { %s1952_s0 = inlined_call_operand.hbm [shape: bf16[512,128], index: 0, kind: input, shape index: {}]   ;;  %s1953_s1 = inlined_call_operand.hbm [shape: bf16[2,128,128], index: 1, kind: input, shape index: {}]   ;;  %s1954_s2 = inlined_call_operand.hbm [shape: bf16[2,512,128], index: 2, kind: output, shape index: {}]  }
   0x1   :  { %1968 = sst [smem:[#allocation15_spill]] %s1952_s0 }
   0x2   :  { %7 = vsyncpa [#allocation3], 0 }
   0x3   :  { %9 = vsyncpa [#allocation3 + $0x1], 0 }
   0x4   :  { %10 = vsyncpa [#allocation6], 0 }
   0x5   :  { %12 = vsyncpa [#allocation6 + $0x1], 0 }
   0x6   :  { %13 = vsyncpa [#allocation4], 0 }
   0x7   :  { %15 = vsyncpa [#allocation4 + $0x1], 0  ;;  %s1544_s9 = smov 0   ;;  %s1546_s10 = smov 0  }
   0x8   :  { %s1548_s11 = smov 0   ;;  %s1550_s12 = smov 0  }
   0x9   :  { %s1552_s13 = smov 0   ;;  %s1554_s14 = smov 0  }
   0xa   :  { %s1556_s15 = smov 0   ;;  %s1558_s16 = smov 0  }
   0xb   :  { %s1560_s17 = smov 0   ;;  %s1562_s18 = smov 0  }
   0xc   :  { %s1564_s19 = smov 0   ;;  %s1566_s20 = smov 0  }
   0xd   :  { %s1568_s21 = smov 0   ;;  %s1570_s22 = smov 0  }
   0xe LB: > { %1969 = sst [smem:[#allocation11_spill]] %s1512_s20  ;;  %s30_s23 = sadd.s32 1, %s1512_s20  ;;  %s1520_s22 = sphi %s1570_s22, %s21_s22   ;;  %s1516_s21 = sphi %s1568_s21, %s2010_s21   ;;  %s1512_s20 = sphi %s1566_s20, %s1998_s20   ;;  %s1508_s19 = sphi %s1564_s19, %s1997_s19   ;;  %s1504_s18 = sphi %s1562_s18, %s1996_s18   ;;  %s1500_s17 = sphi %s1560_s17, %s2009_s17   ;;  %s1496_s16 = sphi %s1558_s16, %s2008_s16   ;;  %s1492_s15 = sphi %s1556_s15, %s2007_s15   ;;  %s1488_s14 = sphi %s1554_s14, %s2006_s14   ;;  %s1484_s13 = sphi %s1552_s13, %s2005_s13   ;;  %s1480_s12 = sphi %s1550_s12, %s2004_s12   ;;  %s1476_s11 = sphi %s1548_s11, %s2003_s11   ;;  %s1472_s10 = sphi %s1546_s10, %s2002_s10   ;;  %s1468_s9 = sphi %s1544_s9, %s2001_s9  }
   0xf   : > { %1970 = sst [smem:[#allocation12_spill]] %s1516_s21  ;;  %s1955_s24 = sadd.s32 4294967295, %s1520_s22  }
  0x10   : > { %p1614_p0 = scmp.ge.s32.totalorder %s30_s23, 2  ;;  %p47_p1 = scmp.ne.s32.totalorder %s1500_s17, %s1496_s16 }
  0x11   : > { %p1959_p2 = scmp.eq.s32.totalorder %s1520_s22, 0  ;;  %s40_s26 = sadd.s32 1, %s1500_s17 }
  0x12   : > { %s2012_s23 = smov (%p1614_p0, %s30_s23), 0  ;;  %p53_p3 = scmp.ne.s32.totalorder %s1496_s16, %s1492_s15 }
  0x13   : > { %1972 = sst [smem:[#allocation13_spill]] %s2012_s23  ;;  %s1629_s27 = ssub.s32 %s1512_s20, %s2012_s23 }
  0x14   : > { %p1633_p4 = scmp.eq.s32.totalorder %s1955_s24, 0  ;;  %p38_p5 = scmp.eq.s32.totalorder %s1629_s27, 0 }
  0x15   : > { %p49_p6 = por %p1959_p2, %p47_p1  ;;  %p1958_p8 = scmp.lt.s32.totalorder %s1520_s22, 4 }
  0x16   : > { %s1973_s28 = scalar_select %p1633_p4, 1, 0 }
  0x17   : > { %p1642_p7 = por %p1633_p4, %p53_p3  ;;  %s131_s3 = sand.u32 1, %s1500_s17  }
  0x18   : > { %s1647_s30 = scalar_select %p38_p5, %s1500_s17, %s40_s26  }
  0x19   : > { %s1974_s29 = scalar_select %p1642_p7, 1, 0 }
  0x1a   : > { %s862_s4 = sshll.u32 %s131_s3, 7  ;;  %s934_s5 = sshll.u32 %s1512_s20, 11 }
  0x1b   : > { %s1975_s0 = sld [smem:[#allocation15_spill]]  ;;  %s135_s15 = scalar_lea.vmem [#allocation2], %s862_s4 }
  0x1c   : > { %s142_s24 = sshll.u32 %s135_s15, 4  ;;  %p1661_p9 = pnand %p1958_p8, %p49_p6  ;;  %s1657_s24 = int_to_ptr.vmem [resolvable:$true] %s142_s24 }
  0x1d   : > { %s1666_s23 = scalar_lea.sflag [#allocation3], %s131_s3 }
  0x1e   : > { %p1312_p12 = pneg %p1661_p9 }
  0x21   : > { %s1655_s8 = scalar_lea.hbm %s1975_s0, %s934_s5  ;;  %s1315_s7 = scalar_lea.hbm %s1975_s0, 4096 }
  0x22   : > { %s1310_s5 = scalar_lea.hbm %s1655_s8, 2048  ;;  %p1316_p3 = scmp.lt.u32.totalorder %s1655_s8, %s1975_s0 }
  0x23   : > { %p1311_p11 = scmp.ne.s32.totalorder %s1655_s8, %s1310_s5  ;;  %p1317_p5 = scmp.lt.u32.totalorder %s1315_s7, %s1310_s5 }
  0x24   : > { %p1319_p8 = scmp.lt.u32.totalorder %s1310_s5, %s1655_s8 }
  0x25   : > { %p1313_p13 = pnand %p1312_p12, %p1311_p11  ;;  %p1318_p6 = por %p1317_p5, %p1316_p3 }
  0x27   : > { %p1314_p1 = pneg %p1313_p13  ;;  %p1320_p2 = por %p1319_p8, %p1318_p6 }
  0x29   : > { %p1321_p10 = pnand %p1320_p2, %p1314_p1 }
  0x2b   : > { %1324 = shalt.err (!%p1321_p10)
}
  0x2c   : > { %s1325_s3 = scalar_lea.vmem %s1657_s24, 2048  ;;  %s1522_s4 = smov [#allocation2]  }
  0x2d   : > { %p1326_p11 = scmp.ne.s32.totalorder %s1657_s24, %s1325_s3  ;;  %s1330_s6 = sshll.u32 %s1522_s4, 4  ;;  %s1331_s6 = int_to_ptr.vmem [resolvable:$false] %s1330_s6 }
  0x2e   : > { %s1332_s20 = scalar_lea.vmem %s1331_s6, 4096  ;;  %p1333_p4 = scmp.lt.s32.totalorder %s1657_s24, %s1331_s6 }
  0x2f   : > { %p1328_p13 = pnand %p1326_p11, %p1312_p12  ;;  %p1334_p3 = scmp.lt.s32.totalorder %s1332_s20, %s1325_s3 }
  0x31   : > { %p1329_p7 = pneg %p1328_p13  ;;  %p1335_p5 = por %p1334_p3, %p1333_p4 }
  0x33   : > { %p1336_p8 = pnand %p1335_p5, %p1329_p7 }
  0x35   : > { %1339 = shalt.err (!%p1336_p8)
}
  0x36   : > { %s1962_s5 = smov 64   ;;  %s1963_s7 = smov 4  }
  0x37   : > { %1160 = dma.hbm_to_vmem [thread:$0]  (!%p1661_p9), %s1655_s8, 2048, %s1657_s24, %s1666_s23, %s1962_s5, %s1962_s5, %s1963_s7  }
  0x38   : > { %s1977_s15 = sadd.s32 4294967295, %s1520_s22   ;;  %p171_p4 = scmp.lt.s32.totalorder %s1520_s22, 5 }
  0x39   : > { %p1699_p2 = scmp.eq.s32.totalorder %s1977_s15, 3  ;;  %p1979_p7 = scmp.ge.s32.totalorder %s1520_s22, 1 }
  0x3a   : > { %s33_s26 = sadd.s32 1, %s1516_s21  ;;  %s859_s23 = sadd.s32 4294967294, %s1520_s22  }
  0x3b   : > { %p1706_p10 = pnand %p1979_p7, %p171_p4  ;;  %s2014_s26 = smov (!%p1614_p0, %s33_s26), %s1516_s21 }
  0x3c   : > { %s66_s24 = sadd.s32 1, %s1488_s14  ;;  %p35_p9 = scmp.ge.s32.totalorder %s2014_s26, 2 }
  0x3d   : > { %p79_p12 = scmp.ne.s32.totalorder %s1484_s13, %s1480_s12  ;;  %p73_p1 = scmp.ne.s32.totalorder %s1488_s14, %s1484_s13 }
  0x3e   : > { %s94_s8 = sadd.s32 1, %s1476_s11  ;;  %s2016_s26 = smov (%p35_p9, %s2014_s26), 0 }
  0x3f   : > { %1981 = sst [smem:[#allocation14_spill]] %s2016_s26  ;;  %p1982_p6 = scmp.ne.s32.totalorder %s1973_s28, 0 }
  0x40   : > { %p104_p0 = scmp.ne.s32.totalorder %s1476_s11, %s1472_s10  ;;  %s63_s6 = ssub.s32 %s1516_s21, %s2016_s26 }
  0x41   : > { %p1725_p11 = por %p79_p12, %p1982_p6  ;;  %p110_p13 = scmp.ne.s32.totalorder %s1472_s10, %s1468_s9 }
  0x42   : > { %p64_p3 = scmp.eq.s32.totalorder %s63_s6, 0  ;;  %s91_s12 = sor.u32 %s63_s6, %s1629_s27 }
  0x43   : > { %s1983_s25 = scalar_select %p1725_p11, 1, 0 }
  0x44   : > { %p92_p5 = scmp.eq.s32.totalorder %s91_s12, 0  ;;  %p1738_p8 = por %p1699_p2, %p104_p0 }
  0x45   : > { %s1743_s15 = scalar_select %p64_p3, %s1488_s14, %s66_s24  }
  0x46   : > { %s1984_s20 = scalar_select %p1738_p8, 1, 0 }
  0x47   : > { %s1746_s28 = scalar_select %p92_p5, %s1476_s11, %s94_s8  }
  0x48   : > { %p111_p4 = scmp.eq.s32.totalorder %s859_s23, 3  ;;  %s152_s5 = sand.u32 1, %s1488_s14  }
  0x49   : > { %p1985_p7 = scmp.eq.s32.totalorder %s1520_s22, 0  ;;  %s865_s7 = sshll.u32 %s152_s5, 6 }
  0x4a   : > { %p1754_p12 = por %p111_p4, %p110_p13  ;;  %s935_s27 = sshll.u32 %s1516_s21, 10 }
  0x4b   : > { %p75_p9 = por %p73_p1, %p1985_p7  ;;  %s156_s3 = scalar_lea.vmem [#allocation5], %s865_s7 }
  0x4c   : > { %s1986_s0 = scalar_select %p1754_p12, 1, 0 }
  0x4d   : > { %s163_s6 = sshll.u32 %s156_s3, 4  ;;  %s1762_s24 = scalar_lea.hbm %s1953_s1, %s935_s27  ;;  %s1764_s6 = int_to_ptr.vmem [resolvable:$true] %s163_s6 }
  0x4e   : > { %p1987_p2 = scmp.lt.s32.totalorder %s1520_s22, 4  ;;  %s1772_s7 = scalar_lea.sflag [#allocation6], %s152_s5 }
  0x4f   : > { %s1340_s8 = scalar_lea.hbm %s1762_s24, 1024  ;;  %s1345_s3 = scalar_lea.hbm %s1953_s1, 2048 }
  0x50   : > { %p1768_p1 = pnand %p1987_p2, %p75_p9  ;;  %p1341_p6 = scmp.ne.s32.totalorder %s1762_s24, %s1340_s8 }
  0x51   : > { %p1346_p5 = scmp.lt.u32.totalorder %s1762_s24, %s1953_s1  ;;  %p1347_p4 = scmp.lt.u32.totalorder %s1345_s3, %s1340_s8 }
  0x52   : > { %p1342_p0 = pneg %p1768_p1  ;;  %p1349_p9 = scmp.lt.u32.totalorder %s1340_s8, %s1762_s24 }
  0x53   : > { %p1348_p7 = por %p1347_p4, %p1346_p5 }
  0x54   : > { %p1343_p13 = pnand %p1342_p0, %p1341_p6 }
  0x55   : > { %p1350_p2 = por %p1349_p9, %p1348_p7 }
  0x56   : > { %p1344_p3 = pneg %p1343_p13 }
  0x58   : > { %p1351_p12 = pnand %p1350_p2, %p1344_p3 }
  0x5a   : > { %1354 = shalt.err (!%p1351_p12)
}
  0x5b   : > { %s1355_s5 = scalar_lea.vmem %s1764_s6, 1024  ;;  %s1525_s26 = smov [#allocation5]  }
  0x5c   : > { %p1356_p6 = scmp.ne.s32.totalorder %s1764_s6, %s1355_s5  ;;  %s1360_s27 = sshll.u32 %s1525_s26, 4  ;;  %s1361_s27 = int_to_ptr.vmem [resolvable:$false] %s1360_s27 }
  0x5d   : > { %s1362_s21 = scalar_lea.vmem %s1361_s27, 2048  ;;  %p1363_p11 = scmp.lt.s32.totalorder %s1764_s6, %s1361_s27 }
  0x5e   : > { %p1358_p13 = pnand %p1356_p6, %p1342_p0  ;;  %p1364_p5 = scmp.lt.s32.totalorder %s1362_s21, %s1355_s5 }
  0x60   : > { %p1359_p8 = pneg %p1358_p13  ;;  %p1365_p4 = por %p1364_p5, %p1363_p11 }
  0x62   : > { %p1366_p7 = pnand %p1365_p4, %p1359_p8 }
  0x64   : > { %1369 = shalt.err (!%p1366_p7)
}
  0x65   : > { %s1989_s8 = smov 4   ;;  %s1990_s3 = smov 64  }
  0x66   : > { %1163 = dma.hbm_to_vmem [thread:$0]  (!%p1768_p1), %s1762_s24, 1024, %s1764_s6, %s1772_s7, %s1990_s3, %s1990_s3, %s1989_s8  }
  0x67   : > { %175 = sbr.rel (%p1706_p10) target bundleno = 404 (0x194), region = 28  ;;  %s177_s12 = sand.u32 (!%p1706_p10), 1, %s1496_s16  }
  0x68   : > { %s869_s26 = sshll.u32 (!%p1706_p10), %s177_s12, 7  ;;  %s178_s5 = scalar_lea.sflag (!%p1706_p10), [#allocation3], %s177_s12 }
  0x69   : > { %s1806_s27 = scalar_lea.vmem (!%p1706_p10), [#allocation2], %s869_s26  ;;  %p1991_p11 = scmp.ne.s32.totalorder (!%p1706_p10), %s1974_s29, 0 }
  0x6e   : > { %1455 = dma.done.wait (%p1991_p11), %s178_s5, 2048  }
  0x6f   : > { %1457 = vsyncadd (%p1991_p11), %s178_s5, 4294965248  ;;  %s186_s23 = sand.u32 1, %s1484_s13   ;;  %p1992_p10 = scmp.ne.s32.totalorder %s1983_s25, 0 }
  0x70   : > { %s870_s21 = sshll.u32 %s186_s23, 6  ;;  %s187_s6 = scalar_lea.sflag [#allocation6], %s186_s23 }
  0x71   : > { %s1813_s24 = scalar_lea.vmem [#allocation5], %s870_s21 }
  0x72   : > { %1459 = dma.done.wait (%p1992_p10), %s187_s6, 1024  }
  0x73   : > { %1461 = vsyncadd (%p1992_p10), %s187_s6, 4294966272  ;;  %v1286_v0 = vld [vmem:[%s1813_s24] sm:$0xff]   ;;  %v1287_v1 = vld [vmem:[%s1813_s24 + $0x8] sm:$0xff]   ;;  %s213_s29 = sand.u32 1, %s1472_s10   ;;  %s929_s7 = sshll.u32 %s1504_s18, 5 }
  0x74   : > { %1087 = vmatprep.subr.bf16.mxu0 %v1286_v0  ;;  %1135 = vmatprep.subr.bf16.mxu1 %v1286_v0  ;;  %v1288_v2 = vld [vmem:[%s1813_s24 + $0x10] sm:$0xff]   ;;  %v1289_v3 = vld [vmem:[%s1813_s24 + $0x18] sm:$0xff]   ;;  %v1294_v4 = vld [vmem:[%s1806_s27] sm:$0xff]   ;;  %s871_s4 = sshll.u32 %s213_s29, 7  ;;  %s930_s8 = sshll.u32 %s1508_s19, 6 }
  0x75   : > { %1088 = vmatpush3.bf16.msra.mxu0 %v1286_v0  ;;  %1143 = vmatpush3.bf16.msra.mxu1 %v1286_v0  ;;  %v1295_v5 = vld [vmem:[%s1806_s27 + $0x40] sm:$0xff]   ;;  %v1291_v7 = vld [vmem:[%s1813_s24 + $0x28] sm:$0xff]   ;;  %v1292_v8 = vld [vmem:[%s1813_s24 + $0x30] sm:$0xff]   ;;  %s1846_s25 = scalar_lea.vmem [#allocation7], %s871_s4  ;;  %s745_s3 = sadd.s32 %s930_s8, %s929_s7 }
  0x76   : > { %1089 = vmatprep.subr.bf16.mxu0 %v1287_v1  ;;  %1136 = vmatprep.subr.bf16.mxu1 %v1287_v1  ;;  %v1290_v6 = vld [vmem:[%s1813_s24 + $0x20] sm:$0xff]   ;;  %v1293_v9 = vld [vmem:[%s1813_s24 + $0x38] sm:$0xff]   ;;  %v1296_v10 = vld [vmem:[%s1806_s27 + $0x8] sm:$0xff]   ;;  %s931_s12 = sshll.u32 %s745_s3, 6  ;;  %s748_s18 = sshll.u32 %s1846_s25, 4  ;;  %s1868_s18 = int_to_ptr.vmem [resolvable:$true] %s748_s18 }
  0x77   : > { %1103 = vmatprep.mubr.bf16.mxu0 %v1294_v4  ;;  %1119 = vmatprep.mubr.bf16.mxu1 %v1295_v5  ;;  %v1297_v11 = vld [vmem:[%s1806_s27 + $0x48] sm:$0xff]   ;;  %v1298_v12 = vld [vmem:[%s1806_s27 + $0x10] sm:$0xff]   ;;  %v1300_v14 = vld [vmem:[%s1806_s27 + $0x18] sm:$0xff]   ;;  %s1866_s5 = scalar_lea.hbm %s1954_s2, %s931_s12  ;;  %s1370_s23 = scalar_lea.vmem %s1868_s18, 2048 }
  0x78   : > { %v1299_v13 = vld [vmem:[%s1806_s27 + $0x50] sm:$0xff]   ;;  %v1301_v15 = vld [vmem:[%s1806_s27 + $0x58] sm:$0xff]   ;;  %v1302_v16 = vld [vmem:[%s1806_s27 + $0x20] sm:$0xff]   ;;  %p1371_p8 = scmp.ne.s32.totalorder %s1868_s18, %s1370_s23  ;;  %p1993_p12 = scmp.ne.s32.totalorder %s1984_s20, 0 }
  0x79   : > { %1090 = vmatpush3.bf16.msra.mxu0 %v1287_v1  ;;  %1144 = vmatpush3.bf16.msra.mxu1 %v1287_v1  ;;  %v1303_v17 = vld [vmem:[%s1806_s27 + $0x60] sm:$0xff]   ;;  %v1304_v18 = vld [vmem:[%s1806_s27 + $0x28] sm:$0xff]   ;;  %v1306_v20 = vld [vmem:[%s1806_s27 + $0x30] sm:$0xff]   ;;  %s1526_s21 = smov [#allocation7]  }
  0x7a   : > { %1091 = vmatprep.subr.bf16.mxu0 %v1288_v2  ;;  %1137 = vmatprep.subr.bf16.mxu1 %v1288_v2  ;;  %v1305_v19 = vld [vmem:[%s1806_s27 + $0x68] sm:$0xff]   ;;  %v1307_v21 = vld [vmem:[%s1806_s27 + $0x70] sm:$0xff]   ;;  %v1308_v22 = vld [vmem:[%s1806_s27 + $0x38] sm:$0xff]   ;;  %p1372_p1 = pnand %p1371_p8, %p1993_p12  ;;  %s1374_s6 = sshll.u32 %s1526_s21, 4  ;;  %s1375_s6 = int_to_ptr.vmem [resolvable:$false] %s1374_s6 }
  0x7b   : > { %v1309_v23 = vld [vmem:[%s1806_s27 + $0x78] sm:$0xff]   ;;  %s1876_s27 = scalar_lea.sflag [#allocation4], %s213_s29  ;;  %s1376_s24 = scalar_lea.vmem %s1375_s6, 4096 }
  0x7c   : > { %p1373_p0 = pneg %p1372_p1  ;;  %p1377_p3 = scmp.lt.s32.totalorder %s1868_s18, %s1375_s6 }
  0x7d   : > { %1092 = vmatpush3.bf16.msra.mxu0 %v1288_v2  ;;  %1145 = vmatpush3.bf16.msra.mxu1 %v1288_v2  ;;  %p1378_p9 = scmp.lt.s32.totalorder %s1376_s24, %s1370_s23 }
  0x7e   : > { %1093 = vmatprep.subr.bf16.mxu0 %v1289_v3  ;;  %1138 = vmatprep.subr.bf16.mxu1 %v1289_v3 }
  0x7f   : > { %p1379_p2 = por %p1378_p9, %p1377_p3 }
  0x81   : > { %1094 = vmatpush3.bf16.msra.mxu0 %v1289_v3  ;;  %1146 = vmatpush3.bf16.msra.mxu1 %v1289_v3  ;;  %p1380_p6 = pnand %p1379_p2, %p1373_p0 }
  0x82   : > { %1095 = vmatprep.subr.bf16.mxu0 %v1290_v6  ;;  %1139 = vmatprep.subr.bf16.mxu1 %v1290_v6 }
  0x85   : > { %1096 = vmatpush3.bf16.msra.mxu0 %v1290_v6  ;;  %1147 = vmatpush3.bf16.msra.mxu1 %v1290_v6 }
  0x86   : > { %1097 = vmatprep.subr.bf16.mxu0 %v1291_v7  ;;  %1140 = vmatprep.subr.bf16.mxu1 %v1291_v7 }
  0x89   : > { %1098 = vmatpush3.bf16.msra.mxu0 %v1291_v7  ;;  %1148 = vmatpush3.bf16.msra.mxu1 %v1291_v7 }
  0x8a   : > { %1099 = vmatprep.subr.bf16.mxu0 %v1292_v8  ;;  %1141 = vmatprep.subr.bf16.mxu1 %v1292_v8 }
  0x8d   : > { %1100 = vmatpush3.bf16.msra.mxu0 %v1292_v8  ;;  %1149 = vmatpush3.bf16.msra.mxu1 %v1292_v8 }
  0x8e   : > { %1101 = vmatprep.subr.bf16.mxu0 %v1293_v9  ;;  %1142 = vmatprep.subr.bf16.mxu1 %v1293_v9 }
  0x91   : > { %1102 = vmatpush3.bf16.msra.mxu0 %v1293_v9  ;;  %1150 = vmatpush3.bf16.msra.mxu1 %v1293_v9 }
  0x94   : > { %1104 = vmatmul.mubr.bf16.vlgmr.msra.gmra.mrb[0].mxu0 %v1296_v10  ;;  %1120 = vmatmul.mubr.bf16.vlgmr.msra.gmra.mrb[0].mxu1 %v1297_v11 }
  0x95   : > { %1107 = vmatprep.mubr.bf16.mxu0 %v1298_v12  ;;  %1123 = vmatprep.mubr.bf16.mxu1 %v1299_v13 }
  0x9c   : > { %1108 = vmatmul.mubr.bf16.gmra.mrb[4].mxu0 %v1300_v14  ;;  %1124 = vmatmul.mubr.bf16.gmra.mrb[4].mxu1 %v1301_v15 }
  0x9d   : > { %1111 = vmatprep.mubr.bf16.mxu0 %v1302_v16  ;;  %1127 = vmatprep.mubr.bf16.mxu1 %v1303_v17 }
  0xa4   : > { %1112 = vmatmul.mubr.bf16.gmra.mrb[8].mxu0 %v1304_v18  ;;  %1128 = vmatmul.mubr.bf16.gmra.mrb[8].mxu1 %v1305_v19 }
  0xa5   : > { %1115 = vmatprep.mubr.bf16.mxu0 %v1306_v20  ;;  %1131 = vmatprep.mubr.bf16.mxu1 %v1307_v21 }
  0xac   : > { %1116 = vmatmul.mubr.bf16.gmra.mrb[12].mxu0 %v1308_v22  ;;  %1132 = vmatmul.mubr.bf16.gmra.mrb[12].mxu1 %v1309_v23 }
 0x167   : > { %v1105_v24 = vpop.f32.mrb[0].mxu0  ;;  %v1121_v25 = vpop.f32.mrb[0].mxu1 }
 0x168   : > { %v445_v26 = vpop.f32.mrb[1].mxu0  ;;  %v509_v27 = vpop.f32.mrb[1].mxu1 }
 0x169   : > { %v1106_v28 = vpop.f32.mrb[2].mxu0  ;;  %v1122_v29 = vpop.f32.mrb[2].mxu1 }
 0x16a   : > { %v976_v30 = vpack.c.bf16 %v1106_v28, %v1105_v24  ;;  %v1016_v31 = vpack.c.bf16 %v1122_v29, %v1121_v25  ;;  %v448_v32 = vpop.f32.mrb[3].mxu0  ;;  %v512_v33 = vpop.f32.mrb[3].mxu1 }
 0x16b   : > { %v971_v34 = vpack.c.bf16 %v448_v32, %v445_v26  ;;  %v1011_v35 = vpack.c.bf16 %v512_v33, %v509_v27 }
 0x16c   : > { %1048 = vst [vmem:[%s1846_s25 + $0x8] sm:$0xff] %v976_v30   ;;  %1056 = vst [vmem:[%s1846_s25 + $0x48] sm:$0xff] %v1016_v31  }
 0x16d   : > { %972 = vst [vmem:[%s1846_s25] sm:$0xff] %v971_v34   ;;  %1055 = vst [vmem:[%s1846_s25 + $0x40] sm:$0xff] %v1011_v35  }
 0x16f   : > { %v1109_v36 = vpop.f32.mrb[4].mxu0  ;;  %v1125_v37 = vpop.f32.mrb[4].mxu1 }
 0x170   : > { %v461_v38 = vpop.f32.mrb[5].mxu0  ;;  %v525_v39 = vpop.f32.mrb[5].mxu1 }
 0x171   : > { %v1110_v40 = vpop.f32.mrb[6].mxu0  ;;  %v1126_v41 = vpop.f32.mrb[6].mxu1 }
 0x172   : > { %v986_v42 = vpack.c.bf16 %v1110_v40, %v1109_v36  ;;  %v1026_v43 = vpack.c.bf16 %v1126_v41, %v1125_v37  ;;  %v464_v44 = vpop.f32.mrb[7].mxu0  ;;  %v528_v45 = vpop.f32.mrb[7].mxu1 }
 0x173   : > { %v981_v46 = vpack.c.bf16 %v464_v44, %v461_v38  ;;  %v1021_v47 = vpack.c.bf16 %v528_v45, %v525_v39 }
 0x174   : > { %1050 = vst [vmem:[%s1846_s25 + $0x18] sm:$0xff] %v986_v42   ;;  %1058 = vst [vmem:[%s1846_s25 + $0x58] sm:$0xff] %v1026_v43  }
 0x175   : > { %1049 = vst [vmem:[%s1846_s25 + $0x10] sm:$0xff] %v981_v46   ;;  %1057 = vst [vmem:[%s1846_s25 + $0x50] sm:$0xff] %v1021_v47  }
 0x177   : > { %v1113_v48 = vpop.f32.mrb[8].mxu0  ;;  %v1129_v49 = vpop.f32.mrb[8].mxu1 }
 0x178   : > { %v477_v50 = vpop.f32.mrb[9].mxu0  ;;  %v541_v51 = vpop.f32.mrb[9].mxu1 }
 0x179   : > { %v1114_v52 = vpop.f32.mrb[10].mxu0  ;;  %v1130_v53 = vpop.f32.mrb[10].mxu1 }
 0x17a   : > { %v996_v54 = vpack.c.bf16 %v1114_v52, %v1113_v48  ;;  %v1036_v55 = vpack.c.bf16 %v1130_v53, %v1129_v49  ;;  %v480_v56 = vpop.f32.mrb[11].mxu0  ;;  %v544_v57 = vpop.f32.mrb[11].mxu1 }
 0x17b   : > { %v991_v58 = vpack.c.bf16 %v480_v56, %v477_v50  ;;  %v1031_v59 = vpack.c.bf16 %v544_v57, %v541_v51 }
 0x17c   : > { %1052 = vst [vmem:[%s1846_s25 + $0x28] sm:$0xff] %v996_v54   ;;  %1060 = vst [vmem:[%s1846_s25 + $0x68] sm:$0xff] %v1036_v55  }
 0x17d   : > { %1051 = vst [vmem:[%s1846_s25 + $0x20] sm:$0xff] %v991_v58   ;;  %1059 = vst [vmem:[%s1846_s25 + $0x60] sm:$0xff] %v1031_v59  }
 0x17f   : > { %v1117_v60 = vpop.f32.mrb[12].mxu0  ;;  %v1133_v61 = vpop.f32.mrb[12].mxu1 }
 0x180   : > { %v493_v62 = vpop.f32.mrb[13].mxu0  ;;  %v557_v63 = vpop.f32.mrb[13].mxu1 }
 0x181   : > { %v1118_v0 = vpop.f32.mrb[14].mxu0  ;;  %v1134_v1 = vpop.f32.mrb[14].mxu1 }
 0x182   : > { %v1006_v2 = vpack.c.bf16 %v1118_v0, %v1117_v60  ;;  %v1046_v3 = vpack.c.bf16 %v1134_v1, %v1133_v61  ;;  %v496_v4 = vpop.f32.mrb[15].mxu0  ;;  %v560_v5 = vpop.f32.mrb[15].mxu1 }
 0x183   : > { %v1001_v6 = vpack.c.bf16 %v496_v4, %v493_v62  ;;  %v1041_v7 = vpack.c.bf16 %v560_v5, %v557_v63 }
 0x184   : > { %1054 = vst [vmem:[%s1846_s25 + $0x38] sm:$0xff] %v1006_v2   ;;  %1062 = vst [vmem:[%s1846_s25 + $0x78] sm:$0xff] %v1046_v3  }
 0x185   : > { %1053 = vst [vmem:[%s1846_s25 + $0x30] sm:$0xff] %v1001_v6   ;;  %1061 = vst [vmem:[%s1846_s25 + $0x70] sm:$0xff] %v1041_v7  }
 0x186   : > { %1383 = shalt.err (!%p1380_p6)
}
 0x187   : > { %s1384_s29 = scalar_lea.hbm %s1866_s5, 2048  ;;  %s1388_s7 = scalar_lea.hbm %s1954_s2, 8192 }
 0x188   : > { %p1385_p13 = scmp.ne.s32.totalorder %s1866_s5, %s1384_s29  ;;  %p1389_p7 = scmp.lt.u32.totalorder %s1866_s5, %s1954_s2 }
 0x189   : > { %p1390_p11 = scmp.lt.u32.totalorder %s1388_s7, %s1384_s29  ;;  %p1392_p8 = scmp.lt.u32.totalorder %s1384_s29, %s1866_s5 }
 0x18a   : > { %p1386_p5 = pnand %p1385_p13, %p1993_p12 }
 0x18b   : > { %p1391_p10 = por %p1390_p11, %p1389_p7 }
 0x18c   : > { %p1387_p4 = pneg %p1386_p5 }
 0x18d   : > { %p1393_p1 = por %p1392_p8, %p1391_p10 }
 0x18f   : > { %p1394_p0 = pnand %p1393_p1, %p1387_p4 }
 0x191   : > { %1397 = shalt.err (!%p1394_p0)
}
 0x192   : > { %s1527_s12 = smov 64   ;;  %s1528_s19 = smov 4  }
 0x193   : > { %1155 = dma.vmem_to_hbm [thread:$0]  (%p1993_p12), %s1868_s18, 2048, %s1866_s5, %s1876_s27, %s1527_s12, %s1527_s12, %s1528_s19  }
 0x194 PF: > { %p1169_p3 = scmp.ge.s32.totalorder %s1520_s22, 2  ;;  %s763_s26 = sand.u32 1, %s1468_s9  }
 0x195   : > { %p1994_p9 = scmp.ne.s32.totalorder %s1986_s0, 0  ;;  %s764_s23 = scalar_lea.sflag [#allocation4], %s763_s26 }
 0x197   : > { %p1165_p2 = pnand %p1169_p3, %p1994_p9 }
 0x199   : > { %1463 = dma.done.wait (!%p1165_p2), %s764_s23, 2048  }
 0x19a   : > { %1465 = vsyncadd (!%p1165_p2), %s764_s23, 4294965248  ;;  %s21_s22 = sadd.s32 1, %s1520_s22   ;;  %s1996_s18 = sld [smem:[#allocation11_spill]] }
 0x19b   : > { %p1905_p6 = scmp.ge.s32.totalorder %s21_s22, 6   ;;  %s1997_s19 = sld [smem:[#allocation12_spill]] }
 0x19c   : > { %s1998_s20 = sld [smem:[#allocation13_spill]]  ;;  %s1999_s0 = sld [smem:[#allocation14_spill]] }
 0x19d   : > { %s2001_s9 = smov %s1472_s10  ;;  %s2002_s10 = smov %s1476_s11 }
 0x19e   : > { %s2003_s11 = smov %s1746_s28  ;;  %s2004_s12 = smov %s1484_s13 }
 0x19f   : > { %s2005_s13 = smov %s1488_s14  ;;  %s2006_s14 = smov %s1743_s15 }
 0x1a0   : > { %s2007_s15 = smov %s1496_s16  ;;  %s2008_s16 = smov %s1500_s17 }
 0x1a1   : > { %s2009_s17 = smov %s1647_s30  ;;  %20 = sbr.rel (!%p1905_p6) target bundleno = 14 (0xe), region = 86 }
 0x1a2   : > { %s2010_s21 = smov %s1999_s0 }
 0x1a8   :  { %769 = vsyncpa [#allocation3], 1 }
 0x1a9   :  { %771 = vsyncpa [#allocation3 + $0x1], 1 }
 0x1aa   :  { %772 = vsyncpa [#allocation6], 1 }
 0x1ab   :  { %774 = vsyncpa [#allocation6 + $0x1], 1 }
 0x1ac   :  { %775 = vsyncpa [#allocation4], 1 }
 0x1ad   :  { %777 = vsyncpa [#allocation4 + $0x1], 1 }

</bundles_post_ra>
